<compile_context>
chip_gen: v7x
topology: tpu7x:2x2x1
jax: 0.10.0
libtpu: 0.0.40
codegen_flags: <defaults>
</compile_context>

<pallas_src>
import functools

import jax
import jax.numpy as jnp
from jax import lax
from jax.experimental import pallas as pl
from jax.experimental.pallas import tpu as pltpu

_LANE = 128
_SUBLANE = 8


def _round_up(x, m):
    return ((x + m - 1) // m) * m


def _joint_actor_kernel(
    state_ref,
    w1_ref, b1_ref, ln_g_ref, ln_b_ref,
    w2_ref, b2_ref,
    w3_ref, b3_ref,
    w4_ref, b4_ref,
    mean_ref,
    *,
    hidden_dim,  # TRUE (unpadded) hidden width, used for LayerNorm statistics
):
    # Weights may be bf16 (MXU fast path) or f32; activations are cast to the
    # weight dtype only at the dot inputs. Everything elementwise stays f32.
    mxu_dtype = w1_ref.dtype
    x = state_ref[...].astype(jnp.float32)                    # [tb, input_dim]

    # --- feature_extractor: Linear -> ReLU -> LayerNorm (two-pass stats) ----
    h = jnp.dot(x.astype(mxu_dtype), w1_ref[...],
                preferred_element_type=jnp.float32) + b1_ref[...]
    h = jnp.maximum(h, 0.0)                                    # padded lanes == 0

    h_pad = h.shape[-1]
    inv_n = 1.0 / hidden_dim
    mu = jnp.sum(h, axis=-1, keepdims=True) * inv_n            # pads are 0 -> exact mean
    hc = h - mu
    if h_pad != hidden_dim:
        # Mask padded lanes so they do not leak into the variance.
        lane = lax.broadcasted_iota(jnp.int32, h.shape, dimension=1)
        hc = jnp.where(lane < hidden_dim, hc, 0.0)
    var = jnp.sum(hc * hc, axis=-1, keepdims=True) * inv_n     # matches torch LayerNorm
    inv = lax.rsqrt(var + 1e-5)
    h = hc * inv * ln_g_ref[...] + ln_b_ref[...]               # pad lanes: 0*g + 0 == 0

    # --- actor MLP: Linear -> ReLU -> Linear -> ReLU -> Linear -> Tanh ------
    a = jnp.dot(h.astype(mxu_dtype), w2_ref[...],
                preferred_element_type=jnp.float32) + b2_ref[...]
    a = jnp.maximum(a, 0.0)
    a = jnp.dot(a.astype(mxu_dtype), w3_ref[...],
                preferred_element_type=jnp.float32) + b3_ref[...]
    a = jnp.maximum(a, 0.0)
    a = jnp.dot(a.astype(mxu_dtype), w4_ref[...],
                preferred_element_type=jnp.float32) + b4_ref[...]
    mean_ref[...] = jnp.tanh(a).astype(mean_ref.dtype)         # lane-dense [tb, a_pad]


def joint_actor_forward(state, params, *, tile_b=1024, out_dtype=jnp.float32):
    """Returns (action_mean [B, action_dim], action_std [B, action_dim])."""
    B, input_dim = state.shape
    action_dim = params["log_std"].shape[-1]
    hidden_dim = int(params["hidden_dim"])        # true width (LN divisor)
    h_pad = params["w1"].shape[1]                 # hidden padded to 256-multiple
    a_pad = params["w4"].shape[1]                 # action_dim padded to 128-multiple

    # --- batch tiling: biggest tile that fits, but at least 2 grid steps when
    # the batch allows it, so both v7x TensorCores get work ("parallel" axis).
    b_ru = _round_up(B, _SUBLANE)
    tb = min(_round_up(tile_b, _SUBLANE), b_ru)
    if b_ru >= 2 * _SUBLANE:
        tb = min(tb, _round_up(pl.cdiv(b_ru, 2), _SUBLANE))
    b_pad = _round_up(B, tb)
    if b_pad != B:
        state = jnp.pad(state, ((0, b_pad - B), (0, 0)))
    grid = (b_pad // tb,)

    weight_keys = ["w1", "b1", "ln_g", "ln_b", "w2", "b2", "w3", "b3", "w4", "b4"]
    weight_args = [params[k] for k in weight_keys]

    in_specs = [pl.BlockSpec((tb, input_dim), lambda i: (i, 0))]
    # Weights/biases: full-array blocks, constant index map (VMEM-resident
    # across grid steps) and single-buffered -- they never change, so 2-deep
    # buffering would only double their VMEM footprint.
    in_specs += [
        pl.BlockSpec(w.shape, lambda i: (0, 0), pipeline_mode=pl.Buffered(1))
        for w in weight_args
    ]
    out_spec = pl.BlockSpec((tb, a_pad), lambda i: (i, 0))

    out_itemsize = jnp.dtype(out_dtype).itemsize

    # --- VMEM budget derived from the actual footprint ----------------------
    weight_bytes = sum(int(w.size) * jnp.dtype(w.dtype).itemsize
                       for w in weight_args)                    # x1 (single-buffered)
    state_bytes = 2 * tb * input_dim * 4                        # double-buffered input
    out_bytes = 2 * tb * a_pad * out_itemsize                   # double-buffered output
    act_bytes = 4 * tb * max(h_pad, a_pad) * 4                  # live f32 activations
    footprint = weight_bytes + state_bytes + out_bytes + act_bytes
    try:
        vmem_cap = int(pltpu.get_tpu_info().vmem_capacity_bytes)  # 128 MiB v5e/v6e, 64 MiB v7x
    except Exception:
        vmem_cap = 64 * 1024 * 1024
    vmem_limit = int(min(max(2 * footprint + (4 << 20), 32 << 20),
                         int(vmem_cap * 0.9)))

    flops = 2 * b_pad * (input_dim * h_pad + 2 * h_pad * h_pad + h_pad * a_pad)
    bytes_accessed = (b_pad * input_dim * 4 + weight_bytes
                      + b_pad * a_pad * out_itemsize)
    transcendentals = b_pad * a_pad + b_pad      # tanh + rsqrt

    kernel = functools.partial(_joint_actor_kernel, hidden_dim=hidden_dim)

    mean_pad = pl.pallas_call(
        kernel,
        out_shape=jax.ShapeDtypeStruct((b_pad, a_pad), out_dtype),
        grid=grid,
        in_specs=in_specs,
        out_specs=out_spec,
        compiler_params=pltpu.CompilerParams(
            dimension_semantics=("parallel",),      # megacore sharding on v7x
            vmem_limit_bytes=vmem_limit,
        ),
        cost_estimate=pl.CostEstimate(
            flops=flops,
            transcendentals=transcendentals,
            bytes_accessed=bytes_accessed,
        ),
    )(state, *weight_args)

    mean = mean_pad[:B, :action_dim]
    # std is state-independent: compute once in the wrapper, no HBM writeback
    # of a full [B, action_dim] tensor from the kernel.
    std_row = jnp.maximum(jnp.exp(params["log_std"]), 1e-3)     # [1, action_dim]
    std = jnp.broadcast_to(std_row, mean.shape)
    return mean, std


def _xavier_uniform(key, fan_in, fan_out):
    # matches nn.init.xavier_uniform_ gain=1.0 (true fan dims, pre-padding)
    limit = (6.0 / (fan_in + fan_out)) ** 0.5
    return jax.random.uniform(
        key, (fan_in, fan_out), dtype=jnp.float32, minval=-limit, maxval=limit
    )


def init_joint_actor_params(key, input_dim, hidden_dim, action_dim,
                            *, mxu_dtype=jnp.bfloat16, hidden_multiple=256):
    """Weights stored [in, out] (transposed from PyTorch) in `mxu_dtype`.

    hidden_dim is zero-padded to a multiple of `hidden_multiple` (256 is
    MXU-dense on v6e/v7x and a 128-multiple for v5e); action_dim is padded to
    a multiple of 128 so the final store is lane-dense.  All padding
    (weight rows/cols, biases, ln_g, ln_b) is zero, so padded lanes stay
    exactly zero throughout the network; the LayerNorm divisor is the TRUE
    hidden_dim and padded lanes are masked out of the variance in-kernel.
    """
    k1, k2, k3, k4 = jax.random.split(key, 4)
    h_pad = _round_up(hidden_dim, hidden_multiple)
    a_pad = _round_up(action_dim, _LANE)
    dh = h_pad - hidden_dim
    da = a_pad - action_dim

    w1 = jnp.pad(_xavier_uniform(k1, input_dim, hidden_dim), ((0, 0), (0, dh)))
    w2 = jnp.pad(_xavier_uniform(k2, hidden_dim, hidden_dim), ((0, dh), (0, dh)))
    w3 = jnp.pad(_xavier_uniform(k3, hidden_dim, hidden_dim), ((0, dh), (0, dh)))
    w4 = jnp.pad(_xavier_uniform(k4, hidden_dim, action_dim), ((0, dh), (0, da)))

    params = {
        "w1": w1.astype(mxu_dtype),
        "b1": jnp.zeros((1, h_pad), jnp.float32),
        "ln_g": jnp.pad(jnp.ones((1, hidden_dim), jnp.float32), ((0, 0), (0, dh))),
        "ln_b": jnp.zeros((1, h_pad), jnp.float32),
        "w2": w2.astype(mxu_dtype),
        "b2": jnp.zeros((1, h_pad), jnp.float32),
        "w3": w3.astype(mxu_dtype),
        "b3": jnp.zeros((1, h_pad), jnp.float32),
        "w4": w4.astype(mxu_dtype),
        "b4": jnp.zeros((1, a_pad), jnp.float32),
        "log_std": jnp.zeros((1, action_dim), jnp.float32),     # nn.Parameter(zeros)
        "hidden_dim": hidden_dim,   # true width (Python int); not passed to the kernel
    }
    return params


def _reference_forward(state, p):
    # pure-JAX f32 reference matching the PyTorch module exactly (unpadded)
    hd = int(p["hidden_dim"])
    ad = p["log_std"].shape[-1]
    w1 = p["w1"][:, :hd].astype(jnp.float32)
    b1 = p["b1"][:, :hd]
    g = p["ln_g"][:, :hd]
    bln = p["ln_b"][:, :hd]
    w2 = p["w2"][:hd, :hd].astype(jnp.float32)
    b2 = p["b2"][:, :hd]
    w3 = p["w3"][:hd, :hd].astype(jnp.float32)
    b3 = p["b3"][:, :hd]
    w4 = p["w4"][:hd, :ad].astype(jnp.float32)
    b4 = p["b4"][:, :ad]
    h = jnp.maximum(state @ w1 + b1, 0.0)
    mu = jnp.mean(h, axis=-1, keepdims=True)
    var = jnp.mean((h - mu) ** 2, axis=-1, keepdims=True)
    h = (h - mu) / jnp.sqrt(var + 1e-5) * g + bln
    a = jnp.maximum(h @ w2 + b2, 0.0)
    a = jnp.maximum(a @ w3 + b3, 0.0)
    mean = jnp.tanh(a @ w4 + b4)
    std = jnp.broadcast_to(jnp.maximum(jnp.exp(p["log_std"]), 1e-3), mean.shape)
    return mean, std


if __name__ == "__main__":
    key = jax.random.PRNGKey(0)
    k_param, k_state, k_state2 = jax.random.split(key, 3)

    B, input_dim, hidden_dim, action_dim = 2, 16, 32, 8

    # --- check 1: f32 weights, tiny batch (single grid step), tight tolerance
    params_f32 = init_joint_actor_params(
        k_param, input_dim, hidden_dim, action_dim, mxu_dtype=jnp.float32)
    state = jax.random.normal(k_state, (B, input_dim), dtype=jnp.float32)

    mean, std = joint_actor_forward(state, params_f32)
    jax.block_until_ready((mean, std))
    ref_mean, ref_std = _reference_forward(state, params_f32)
    assert mean.shape == (B, action_dim) and std.shape == (B, action_dim)
    assert jnp.allclose(mean, ref_mean, atol=1e-5, rtol=1e-5)
    assert jnp.allclose(std, ref_std, atol=1e-6, rtol=1e-6)

    # --- check 2: f32 weights, larger ragged batch -> multiple grid steps
    B2 = 50
    state2 = jax.random.normal(k_state2, (B2, input_dim), dtype=jnp.float32)
    mean2, std2 = joint_actor_forward(state2, params_f32, tile_b=16)
    jax.block_until_ready((mean2, std2))
    ref_mean2, ref_std2 = _reference_forward(state2, params_f32)
    assert mean2.shape == (B2, action_dim) and std2.shape == (B2, action_dim)
    assert jnp.allclose(mean2, ref_mean2, atol=1e-5, rtol=1e-5)
    assert jnp.allclose(std2, ref_std2, atol=1e-6, rtol=1e-6)

    # --- check 3: bf16 weights (fast MXU path), loose tolerance (bf16 rounding)
    params_bf16 = init_joint_actor_params(
        k_param, input_dim, hidden_dim, action_dim, mxu_dtype=jnp.bfloat16)
    mean3, std3 = joint_actor_forward(state2, params_bf16, tile_b=16)
    jax.block_until_ready((mean3, std3))
    assert jnp.allclose(mean3, ref_mean2, atol=5e-2)
    assert jnp.allclose(std3, ref_std2, atol=1e-6, rtol=1e-6)

    # --- check 4: default (large) tile_b still splits into >=2 grid steps
    mean4, std4 = joint_actor_forward(state2, params_f32)  # tile_b=1024 default
    jax.block_until_ready((mean4, std4))
    assert jnp.allclose(mean4, ref_mean2, atol=1e-5, rtol=1e-5)

    print("KERNEL_OK")
</pallas_src>

<mosaic_0001>
module attributes {stable_mosaic.version = 11 : i64} {
  func.func @_joint_actor_kernel(%arg0: i32, %arg1: memref<8x16xf32, #tpu.memory_space<vmem>>, %arg2: memref<16x256xf32, #tpu.memory_space<vmem>>, %arg3: memref<1x256xf32, #tpu.memory_space<vmem>>, %arg4: memref<1x256xf32, #tpu.memory_space<vmem>>, %arg5: memref<1x256xf32, #tpu.memory_space<vmem>>, %arg6: memref<256x256xf32, #tpu.memory_space<vmem>>, %arg7: memref<1x256xf32, #tpu.memory_space<vmem>>, %arg8: memref<256x256xf32, #tpu.memory_space<vmem>>, %arg9: memref<1x256xf32, #tpu.memory_space<vmem>>, %arg10: memref<256x128xf32, #tpu.memory_space<vmem>>, %arg11: memref<1x128xf32, #tpu.memory_space<vmem>>, %arg12: memref<8x128xf32, #tpu.memory_space<vmem>>) attributes {dimension_semantics = [#tpu.dimension_semantics<parallel>], iteration_bounds = array<i64: 1>, scalar_prefetch = 0 : i64, scratch_operands = 0 : i64, tpu.core_type = #tpu.core_type<tc>, window_params = [{transform_indices = @transform_0, window_bounds = array<i64: 8, 16>}, {pipeline_mode = #tpu.pipeline_mode<synchronous>, transform_indices = @transform_1, window_bounds = array<i64: 16, 256>}, {pipeline_mode = #tpu.pipeline_mode<synchronous>, transform_indices = @transform_2, window_bounds = array<i64: 1, 256>}, {pipeline_mode = #tpu.pipeline_mode<synchronous>, transform_indices = @transform_3, window_bounds = array<i64: 1, 256>}, {pipeline_mode = #tpu.pipeline_mode<synchronous>, transform_indices = @transform_4, window_bounds = array<i64: 1, 256>}, {pipeline_mode = #tpu.pipeline_mode<synchronous>, transform_indices = @transform_5, window_bounds = array<i64: 256, 256>}, {pipeline_mode = #tpu.pipeline_mode<synchronous>, transform_indices = @transform_6, window_bounds = array<i64: 1, 256>}, {pipeline_mode = #tpu.pipeline_mode<synchronous>, transform_indices = @transform_7, window_bounds = array<i64: 256, 256>}, {pipeline_mode = #tpu.pipeline_mode<synchronous>, transform_indices = @transform_8, window_bounds = array<i64: 1, 256>}, {pipeline_mode = #tpu.pipeline_mode<synchronous>, transform_indices = @transform_9, window_bounds = array<i64: 256, 128>}, {pipeline_mode = #tpu.pipeline_mode<synchronous>, transform_indices = @transform_10, window_bounds = array<i64: 1, 128>}, {transform_indices = @transform_11, window_bounds = array<i64: 8, 128>}]} {
    %c0 = arith.constant 0 : index
    %c0_0 = arith.constant 0 : index
    %0 = vector.load %arg1[%c0, %c0_0] : memref<8x16xf32, #tpu.memory_space<vmem>>, vector<8x16xf32>
    %c0_1 = arith.constant 0 : index
    %c0_2 = arith.constant 0 : index
    %1 = vector.load %arg2[%c0_1, %c0_2] : memref<16x256xf32, #tpu.memory_space<vmem>>, vector<16x256xf32>
    %cst = arith.constant dense<0.000000e+00> : vector<8x256xf32>
    %2 = tpu.matmul %0, %1, %cst {dimension_numbers = #tpu.dot_dimension_numbers<[1], [0], [0], [1], [0, 0, 1, 1], [], []>} : vector<8x16xf32>, vector<16x256xf32>, vector<8x256xf32> -> vector<8x256xf32>
    %c0_3 = arith.constant 0 : index
    %c0_4 = arith.constant 0 : index
    %3 = vector.load %arg3[%c0_3, %c0_4] : memref<1x256xf32, #tpu.memory_space<vmem>>, vector<1x256xf32>
    %4 = vector.broadcast %3 : vector<1x256xf32> to vector<8x256xf32>
    %5 = arith.addf %2, %4 : vector<8x256xf32>
    %cst_5 = arith.constant 0.000000e+00 : f32
    %6 = vector.broadcast %cst_5 : f32 to vector<8x256xf32>
    %7 = arith.maximumf %5, %6 : vector<8x256xf32>
    %cst_6 = arith.constant dense<0.000000e+00> : vector<8xf32>
    %8 = vector.multi_reduction <add>, %7, %cst_6 [1] : vector<8x256xf32> to vector<8xf32>
    %9 = vector.shape_cast %8 : vector<8xf32> to vector<8x1xf32>
    %cst_7 = arith.constant 3.125000e-02 : f32
    %10 = vector.broadcast %cst_7 : f32 to vector<8x1xf32>
    %11 = arith.mulf %9, %10 : vector<8x1xf32>
    %12 = vector.broadcast %11 : vector<8x1xf32> to vector<8x256xf32>
    %13 = arith.subf %7, %12 : vector<8x256xf32>
    %14 = tpu.iota {dimensions = array<i32: 1>} : vector<8x256xi32>
    %c32_i32 = arith.constant 32 : i32
    %15 = vector.broadcast %c32_i32 : i32 to vector<8x256xi32>
    %16 = arith.cmpi slt, %14, %15 : vector<8x256xi32>
    %cst_8 = arith.constant 0.000000e+00 : f32
    %17 = vector.broadcast %cst_8 : f32 to vector<8x256xf32>
    %18 = arith.select %16, %13, %17 : vector<8x256xi1>, vector<8x256xf32>
    %19 = arith.mulf %18, %18 : vector<8x256xf32>
    %cst_9 = arith.constant dense<0.000000e+00> : vector<8xf32>
    %20 = vector.multi_reduction <add>, %19, %cst_9 [1] : vector<8x256xf32> to vector<8xf32>
    %21 = vector.shape_cast %20 : vector<8xf32> to vector<8x1xf32>
    %cst_10 = arith.constant 3.125000e-02 : f32
    %22 = vector.broadcast %cst_10 : f32 to vector<8x1xf32>
    %23 = arith.mulf %21, %22 : vector<8x1xf32>
    %cst_11 = arith.constant 9.99999974E-6 : f32
    %24 = vector.broadcast %cst_11 : f32 to vector<8x1xf32>
    %25 = arith.addf %23, %24 : vector<8x1xf32>
    %26 = math.rsqrt %25 : vector<8x1xf32>
    %27 = vector.broadcast %26 : vector<8x1xf32> to vector<8x256xf32>
    %28 = arith.mulf %18, %27 : vector<8x256xf32>
    %c0_12 = arith.constant 0 : index
    %c0_13 = arith.constant 0 : index
    %29 = vector.load %arg4[%c0_12, %c0_13] : memref<1x256xf32, #tpu.memory_space<vmem>>, vector<1x256xf32>
    %30 = vector.broadcast %29 : vector<1x256xf32> to vector<8x256xf32>
    %31 = arith.mulf %28, %30 : vector<8x256xf32>
    %c0_14 = arith.constant 0 : index
    %c0_15 = arith.constant 0 : index
    %32 = vector.load %arg5[%c0_14, %c0_15] : memref<1x256xf32, #tpu.memory_space<vmem>>, vector<1x256xf32>
    %33 = vector.broadcast %32 : vector<1x256xf32> to vector<8x256xf32>
    %34 = arith.addf %31, %33 : vector<8x256xf32>
    %c0_16 = arith.constant 0 : index
    %c0_17 = arith.constant 0 : index
    %35 = vector.load %arg6[%c0_16, %c0_17] : memref<256x256xf32, #tpu.memory_space<vmem>>, vector<256x256xf32>
    %cst_18 = arith.constant dense<0.000000e+00> : vector<8x256xf32>
    %36 = tpu.matmul %34, %35, %cst_18 {dimension_numbers = #tpu.dot_dimension_numbers<[1], [0], [0], [1], [0, 0, 1, 1], [], []>} : vector<8x256xf32>, vector<256x256xf32>, vector<8x256xf32> -> vector<8x256xf32>
    %c0_19 = arith.constant 0 : index
    %c0_20 = arith.constant 0 : index
    %37 = vector.load %arg7[%c0_19, %c0_20] : memref<1x256xf32, #tpu.memory_space<vmem>>, vector<1x256xf32>
    %38 = vector.broadcast %37 : vector<1x256xf32> to vector<8x256xf32>
    %39 = arith.addf %36, %38 : vector<8x256xf32>
    %cst_21 = arith.constant 0.000000e+00 : f32
    %40 = vector.broadcast %cst_21 : f32 to vector<8x256xf32>
    %41 = arith.maximumf %39, %40 : vector<8x256xf32>
    %c0_22 = arith.constant 0 : index
    %c0_23 = arith.constant 0 : index
    %42 = vector.load %arg8[%c0_22, %c0_23] : memref<256x256xf32, #tpu.memory_space<vmem>>, vector<256x256xf32>
    %cst_24 = arith.constant dense<0.000000e+00> : vector<8x256xf32>
    %43 = tpu.matmul %41, %42, %cst_24 {dimension_numbers = #tpu.dot_dimension_numbers<[1], [0], [0], [1], [0, 0, 1, 1], [], []>} : vector<8x256xf32>, vector<256x256xf32>, vector<8x256xf32> -> vector<8x256xf32>
    %c0_25 = arith.constant 0 : index
    %c0_26 = arith.constant 0 : index
    %44 = vector.load %arg9[%c0_25, %c0_26] : memref<1x256xf32, #tpu.memory_space<vmem>>, vector<1x256xf32>
    %45 = vector.broadcast %44 : vector<1x256xf32> to vector<8x256xf32>
    %46 = arith.addf %43, %45 : vector<8x256xf32>
    %cst_27 = arith.constant 0.000000e+00 : f32
    %47 = vector.broadcast %cst_27 : f32 to vector<8x256xf32>
    %48 = arith.maximumf %46, %47 : vector<8x256xf32>
    %c0_28 = arith.constant 0 : index
    %c0_29 = arith.constant 0 : index
    %49 = vector.load %arg10[%c0_28, %c0_29] : memref<256x128xf32, #tpu.memory_space<vmem>>, vector<256x128xf32>
    %cst_30 = arith.constant dense<0.000000e+00> : vector<8x128xf32>
    %50 = tpu.matmul %48, %49, %cst_30 {dimension_numbers = #tpu.dot_dimension_numbers<[1], [0], [0], [1], [0, 0, 1, 1], [], []>} : vector<8x256xf32>, vector<256x128xf32>, vector<8x128xf32> -> vector<8x128xf32>
    %c0_31 = arith.constant 0 : index
    %c0_32 = arith.constant 0 : index
    %51 = vector.load %arg11[%c0_31, %c0_32] : memref<1x128xf32, #tpu.memory_space<vmem>>, vector<1x128xf32>
    %52 = vector.broadcast %51 : vector<1x128xf32> to vector<8x128xf32>
    %53 = arith.addf %50, %52 : vector<8x128xf32>
    %54 = math.tanh %53 : vector<8x128xf32>
    %c0_33 = arith.constant 0 : index
    %c0_34 = arith.constant 0 : index
    %55 = vector.load %arg12[%c0_33, %c0_34] : memref<8x128xf32, #tpu.memory_space<vmem>>, vector<8x128xf32>
    tpu.vector_store %arg12[%c0_33, %c0_34], %54 {strides = array<i32>} : memref<8x128xf32, #tpu.memory_space<vmem>>, vector<8x128xf32>,
    return
  }
  func.func @transform_0(%arg0: i32) -> (i32, i32) {
    %c0_i32 = arith.constant 0 : i32
    %c0_i32_0 = arith.constant 0 : i32
    return %arg0, %c0_i32 : i32, i32
  }
  func.func @transform_1(%arg0: i32) -> (i32, i32) {
    %c0_i32 = arith.constant 0 : i32
    %c0_i32_0 = arith.constant 0 : i32
    %c0_i32_1 = arith.constant 0 : i32
    return %c0_i32, %c0_i32_0 : i32, i32
  }
  func.func @transform_2(%arg0: i32) -> (i32, i32) {
    %c0_i32 = arith.constant 0 : i32
    %c0_i32_0 = arith.constant 0 : i32
    %c0_i32_1 = arith.constant 0 : i32
    return %c0_i32, %c0_i32_0 : i32, i32
  }
  func.func @transform_3(%arg0: i32) -> (i32, i32) {
    %c0_i32 = arith.constant 0 : i32
    %c0_i32_0 = arith.constant 0 : i32
    %c0_i32_1 = arith.constant 0 : i32
    return %c0_i32, %c0_i32_0 : i32, i32
  }
  func.func @transform_4(%arg0: i32) -> (i32, i32) {
    %c0_i32 = arith.constant 0 : i32
    %c0_i32_0 = arith.constant 0 : i32
    %c0_i32_1 = arith.constant 0 : i32
    return %c0_i32, %c0_i32_0 : i32, i32
  }
  func.func @transform_5(%arg0: i32) -> (i32, i32) {
    %c0_i32 = arith.constant 0 : i32
    %c0_i32_0 = arith.constant 0 : i32
    %c0_i32_1 = arith.constant 0 : i32
    return %c0_i32, %c0_i32_0 : i32, i32
  }
  func.func @transform_6(%arg0: i32) -> (i32, i32) {
    %c0_i32 = arith.constant 0 : i32
    %c0_i32_0 = arith.constant 0 : i32
    %c0_i32_1 = arith.constant 0 : i32
    return %c0_i32, %c0_i32_0 : i32, i32
  }
  func.func @transform_7(%arg0: i32) -> (i32, i32) {
    %c0_i32 = arith.constant 0 : i32
    %c0_i32_0 = arith.constant 0 : i32
    %c0_i32_1 = arith.constant 0 : i32
    return %c0_i32, %c0_i32_0 : i32, i32
  }
  func.func @transform_8(%arg0: i32) -> (i32, i32) {
    %c0_i32 = arith.constant 0 : i32
    %c0_i32_0 = arith.constant 0 : i32
    %c0_i32_1 = arith.constant 0 : i32
    return %c0_i32, %c0_i32_0 : i32, i32
  }
  func.func @transform_9(%arg0: i32) -> (i32, i32) {
    %c0_i32 = arith.constant 0 : i32
    %c0_i32_0 = arith.constant 0 : i32
    %c0_i32_1 = arith.constant 0 : i32
    return %c0_i32, %c0_i32_0 : i32, i32
  }
  func.func @transform_10(%arg0: i32) -> (i32, i32) {
    %c0_i32 = arith.constant 0 : i32
    %c0_i32_0 = arith.constant 0 : i32
    %c0_i32_1 = arith.constant 0 : i32
    return %c0_i32, %c0_i32_0 : i32, i32
  }
  func.func @transform_11(%arg0: i32) -> (i32, i32) {
    %c0_i32 = arith.constant 0 : i32
    %c0_i32_0 = arith.constant 0 : i32
    return %arg0, %c0_i32 : i32, i32
  }
}

</mosaic_0001>

<bundles_post_ra>
// kernel: tpu_custom_call.1
= control target key start
LH: loop header
LB: loop body
LE: loop exit
PB: predicated region body
PF: predicated region fallthrough
CT: control target
= control target key end

     0   :  { %16 = vsyncpa [#allocation3], 0  ;;  %s1230_s0 = inlined_call_operand.hbm [shape: f32[8,16], index: 0, kind: input, shape index: {}]   ;;  %s1231_s1 = inlined_call_operand.hbm [shape: f32[16,256], index: 1, kind: input, shape index: {}]   ;;  %s1232_s2 = inlined_call_operand.vmem [shape: f32[1,256], index: 2, kind: input, shape index: {}]   ;;  %s1233_s3 = inlined_call_operand.vmem [shape: f32[1,256], index: 3, kind: input, shape index: {}]   ;;  %s1234_s4 = inlined_call_operand.vmem [shape: f32[1,256], index: 4, kind: input, shape index: {}]   ;;  %s1235_s5 = inlined_call_operand.hbm [shape: f32[256,256], index: 5, kind: input, shape index: {}]   ;;  %s1236_s6 = inlined_call_operand.vmem [shape: f32[1,256], index: 6, kind: input, shape index: {}]   ;;  %s1237_s7 = inlined_call_operand.hbm [shape: f32[256,256], index: 7, kind: input, shape index: {}]   ;;  %s1238_s8 = inlined_call_operand.vmem [shape: f32[1,256], index: 8, kind: input, shape index: {}]   ;;  %s1239_s9 = inlined_call_operand.hbm [shape: f32[256,128], index: 9, kind: input, shape index: {}]   ;;  %s1240_s10 = inlined_call_operand.vmem [shape: f32[1,128], index: 10, kind: input, shape index: {}]   ;;  %s1241_s11 = inlined_call_operand.hbm [shape: f32[8,128], index: 11, kind: output, shape index: {}]  }
   0x1   :  { %17 = vsyncpa [#allocation6], 0 }
   0x2   :  { %18 = vsyncpa [#allocation9], 0 }
   0x3   :  { %19 = vsyncpa [#allocation4], 0  ;;  %s1032_s17 = smov [#allocation5]   ;;  %s892_s21 = scalar_lea.hbm %s1231_s1, 512 }
   0x4   :  { %s35_s18 = sshll.u32 %s1032_s17, 4  ;;  %p893_p0 = scmp.ne.s32.totalorder %s1231_s1, %s892_s21  ;;  %s36_s18 = int_to_ptr.vmem [resolvable:$true] %s35_s18 }
   0x5   :  { %p896_p1 = scmp.lt.u32.totalorder %s892_s21, %s1231_s1 }
   0x7   :  { %p898_p2 = pnand %p896_p1, %p893_p0 }
   0x9   :  { %901 = shalt.err (!%p898_p2)
}
   0xa   :  { %s902_s26 = scalar_lea.vmem %s36_s18, 512  ;;  %p907_p4 = scmp.lt.s32.totalorder %s36_s18, %s36_s18 }
   0xb   :  { %p903_p3 = scmp.ne.s32.totalorder %s36_s18, %s902_s26  ;;  %p908_p5 = scmp.lt.s32.totalorder %s902_s26, %s902_s26 }
   0xd   :  { %p909_p6 = por %p908_p5, %p907_p4 }
   0xf   :  { %p910_p7 = pnand %p909_p6, %p903_p3 }
  0x11   :  { %913 = shalt.err (!%p910_p7)
}
  0x12   :  { %s1033_s27 = smov 256   ;;  %s1034_s28 = smov 16  }
  0x13   :  { %41 = dma.hbm_to_vmem [thread:$0]  %s1231_s1, 512, %s36_s18, [#allocation6], %s1033_s27, %s1033_s27, %s1034_s28  }
  0x14   :  { %s1035_s12 = smov [#allocation8]   ;;  %s1036_s14 = smov [#allocation2]  }
  0x15   :  { %s67_s13 = sshll.u32 %s1035_s12, 4  ;;  %s26_s15 = sshll.u32 %s1036_s14, 4  ;;  %s68_s13 = int_to_ptr.vmem [resolvable:$true] %s67_s13  ;;  %s27_s15 = int_to_ptr.vmem [resolvable:$true] %s26_s15 }
  0x16   :  { %s914_s19 = scalar_lea.hbm %s1237_s7, 8192 }
  0x17   :  { %p915_p8 = scmp.ne.s32.totalorder %s1237_s7, %s914_s19  ;;  %p918_p9 = scmp.lt.u32.totalorder %s914_s19, %s1237_s7 }
  0x19   :  { %p920_p10 = pnand %p918_p9, %p915_p8 }
  0x1b   :  { %923 = shalt.err (!%p920_p10)
}
  0x1c   :  { %s924_s1 = scalar_lea.vmem %s68_s13, 8192  ;;  %p929_p12 = scmp.lt.s32.totalorder %s68_s13, %s68_s13 }
  0x1d   :  { %p925_p11 = scmp.ne.s32.totalorder %s68_s13, %s924_s1  ;;  %p930_p13 = scmp.lt.s32.totalorder %s924_s1, %s924_s1 }
  0x1f   :  { %p931_p0 = por %p930_p13, %p929_p12 }
  0x21   :  { %p932_p1 = pnand %p931_p0, %p925_p11 }
  0x23   :  { %935 = shalt.err (!%p932_p1)
}
  0x24   :  { %73 = dma.hbm_to_vmem [thread:$0]  %s1237_s7, 8192, %s68_s13, [#allocation9], %s1033_s27, %s1033_s27, %s1034_s28  }
  0x25   :  { %s936_s29 = scalar_lea.hbm %s1230_s0, 128 }
  0x26   :  { %p937_p2 = scmp.ne.s32.totalorder %s1230_s0, %s936_s29  ;;  %p940_p3 = scmp.lt.u32.totalorder %s936_s29, %s1230_s0 }
  0x28   :  { %p942_p4 = pnand %p940_p3, %p937_p2 }
  0x2a   :  { %945 = shalt.err (!%p942_p4)
}
  0x2b   :  { %s946_s17 = scalar_lea.vmem %s27_s15, 128  ;;  %p951_p6 = scmp.lt.s32.totalorder %s27_s15, %s27_s15 }
  0x2c   :  { %p947_p5 = scmp.ne.s32.totalorder %s27_s15, %s946_s17  ;;  %p952_p7 = scmp.lt.s32.totalorder %s946_s17, %s946_s17 }
  0x2e   :  { %p953_p8 = por %p952_p7, %p951_p6 }
  0x30   :  { %p954_p9 = pnand %p953_p8, %p947_p5 }
  0x32   :  { %957 = shalt.err (!%p954_p9)
}
  0x33   :  { %29 = dma.hbm_to_vmem [thread:$0]  %s1230_s0, 128, %s27_s15, [#allocation3]  }
  0x34   :  { %s1037_s19 = smov [#allocation7]   ;;  %s1038_s21 = smov [#allocation10]  }
  0x35   :  { %s53_s20 = sshll.u32 %s1037_s19, 4  ;;  %s81_s22 = sshll.u32 %s1038_s21, 4  ;;  %s54_s20 = int_to_ptr.vmem [resolvable:$true] %s53_s20  ;;  %s82_s22 = int_to_ptr.vmem [resolvable:$true] %s81_s22 }
  0x36   :  { %s958_s18 = scalar_lea.hbm %s1235_s5, 8192 }
  0x37   :  { %p959_p10 = scmp.ne.s32.totalorder %s1235_s5, %s958_s18  ;;  %p962_p11 = scmp.lt.u32.totalorder %s958_s18, %s1235_s5 }
  0x39   :  { %p964_p12 = pnand %p962_p11, %p959_p10 }
  0x3b   :  { %967 = shalt.err (!%p964_p12)
}
  0x3c   :  { %s968_s0 = scalar_lea.vmem %s54_s20, 8192  ;;  %p973_p0 = scmp.lt.s32.totalorder %s54_s20, %s54_s20 }
  0x3d   :  { %p969_p13 = scmp.ne.s32.totalorder %s54_s20, %s968_s0  ;;  %p974_p1 = scmp.lt.s32.totalorder %s968_s0, %s968_s0 }
  0x3f   :  { %p975_p2 = por %p974_p1, %p973_p0 }
  0x41   :  { %p976_p3 = pnand %p975_p2, %p969_p13 }
  0x43   :  { %979 = shalt.err (!%p976_p3)
}
  0x44   :  { %59 = dma.hbm_to_vmem [thread:$0]  %s1235_s5, 8192, %s54_s20, [#allocation6], %s1033_s27, %s1033_s27, %s1034_s28  }
  0x45   :  { %s980_s16 = scalar_lea.hbm %s1239_s9, 4096 }
  0x46   :  { %p981_p4 = scmp.ne.s32.totalorder %s1239_s9, %s980_s16  ;;  %p984_p5 = scmp.lt.u32.totalorder %s980_s16, %s1239_s9 }
  0x48   :  { %p986_p6 = pnand %p984_p5, %p981_p4 }
  0x4a   :  { %989 = shalt.err (!%p986_p6)
}
  0x4b   :  { %s990_s21 = scalar_lea.vmem %s82_s22, 4096  ;;  %p995_p8 = scmp.lt.s32.totalorder %s82_s22, %s82_s22 }
  0x4c   :  { %p991_p7 = scmp.ne.s32.totalorder %s82_s22, %s990_s21  ;;  %p996_p9 = scmp.lt.s32.totalorder %s990_s21, %s990_s21 }
  0x4e   :  { %p997_p10 = por %p996_p9, %p995_p8 }
  0x50   :  { %p998_p11 = pnand %p997_p10, %p991_p7 }
  0x52   :  { %1001 = shalt.err (!%p998_p11)
}
  0x53   :  { %s1039_s5 = smov 128   ;;  %s1040_s27 = smov 8  }
  0x54   :  { %87 = dma.hbm_to_vmem [thread:$0]  %s1239_s9, 4096, %s82_s22, [#allocation9], %s1039_s5, %s1039_s5, %s1040_s27  }
  0x55   :  { %1024 = dma.done.wait [#allocation3], 128  }
  0x56   :  { %1025 = vsyncadd [#allocation3], 4294967168 }
  0x57   :  { %1026 = dma.done.wait [#allocation6], 8704  }
  0x58   :  { %1027 = vsyncadd [#allocation6], 4294958592 }
  0x59   :  { %1028 = dma.done.wait [#allocation9], 12288  }
  0x5a   :  { %1029 = vsyncadd [#allocation9], 4294955008  ;;  %v1041_v0 = vmov 0.0   ;;  %v107_v1 = vld [vmem:[#allocation5 + $0x8] sm:$0xff]  ;;  %v109_v2 = vld [vmem:[#allocation5 + $0x18] sm:$0xff]  ;;  %vm122_vm0 = vcmask 130048   ;;  %v112_v8 = vlaneseq }
  0x5b   :  { %190 = vmatprep.mubr.f32.mxu0 %v1041_v0  ;;  %v106_v3 = vld [vmem:[#allocation5] sm:$0xff]  ;;  %v713_v4 = vpack.c.bf16 %v109_v2, %v107_v1  ;;  %v108_v5 = vld [vmem:[#allocation5 + $0x10] sm:$0xff]  ;;  %v105_v7 = vld [vmem:[#allocation2] sm:$0xff] }
  0x5c   :  { %v715_v6 = vpack.c.bf16 %v108_v5, %v106_v3  ;;  %v113_v9 = vshrl.u32 %v112_v8, 7  ;;  %v110_v11 = vld [vmem:[%s1232_s2] sm:$0x3]  ;;  %v251_v22 = vld [vmem:[#allocation7 + $0x8] sm:$0xff]  ;;  %v250_v24 = vld [vmem:[#allocation7] sm:$0xff] }
  0x5d   :  { %714 = vmatprep.subr.bf16.mxu0 %v713_v4  ;;  %v253_v23 = vld [vmem:[#allocation7 + $0x18] sm:$0xff]  ;;  %v252_v26 = vld [vmem:[#allocation7 + $0x10] sm:$0xff]  ;;  %v255_v27 = vld [vmem:[#allocation7 + $0x28] sm:$0xff] }
  0x5e   :  { %716 = vmatpush1.bf16.msra.mxu0 %v715_v6  ;;  %v1173_v10 = vsub.s32 0, %v113_v9  ;;  %v1178_v12 = vsub.s32 1, %v113_v9  ;;  %v717_v25 = vpack.c.bf16 %v253_v23, %v251_v22  ;;  %v257_v28 = vld [vmem:[#allocation7 + $0x38] sm:$0xff]  ;;  %v719_v29 = vpack.c.bf16 %v252_v26, %v250_v24  ;;  %v254_v31 = vld [vmem:[#allocation7 + $0x20] sm:$0xff]  ;;  %v256_v32 = vld [vmem:[#allocation7 + $0x30] sm:$0xff] }
  0x5f   :  { %v721_v30 = vpack.c.bf16 %v257_v28, %v255_v27  ;;  %v259_v33 = vld [vmem:[#allocation7 + $0x48] sm:$0xff]  ;;  %v261_v34 = vld [vmem:[#allocation7 + $0x58] sm:$0xff]  ;;  %v723_v35 = vpack.c.bf16 %v256_v32, %v254_v31  ;;  %v258_v37 = vld [vmem:[#allocation7 + $0x40] sm:$0xff] }
  0x60   :  { %v115_v13 = vrot.slane %v110_v11, %v1173_v10  ;;  %v119_v14 = vrot.slane %v110_v11, %v1178_v12  ;;  %718 = vmatprep.subr.bf16.mxu1 %v717_v25  ;;  %v725_v36 = vpack.c.bf16 %v261_v34, %v259_v33  ;;  %v260_v38 = vld [vmem:[#allocation7 + $0x50] sm:$0xff]  ;;  %v263_v39 = vld [vmem:[#allocation7 + $0x68] sm:$0xff]  ;;  %v265_v40 = vld [vmem:[#allocation7 + $0x78] sm:$0xff] }
  0x61   :  { %676 = vmatmul.mubr.msk.f32.vlgmr.msra.gmra.mrb[0].mxu0 %vm122_vm0, %v105_v7  ;;  %720 = vmatpush1.bf16.msra.mxu1 %v719_v29  ;;  %v727_v41 = vpack.c.bf16 %v260_v38, %v258_v37  ;;  %v729_v42 = vpack.c.bf16 %v265_v40, %v263_v39  ;;  %v262_v43 = vld [vmem:[#allocation7 + $0x60] sm:$0xff]  ;;  %v264_v44 = vld [vmem:[#allocation7 + $0x70] sm:$0xff]  ;;  %v267_v45 = vld [vmem:[#allocation7 + $0x88] sm:$0xff]  ;;  %v206_v29 = vand.u32 127, %v112_v8 }
  0x62   :  { %722 = vmatprep.subr.bf16.mxu1 %v721_v30  ;;  %v269_v46 = vld [vmem:[#allocation7 + $0x98] sm:$0xff]  ;;  %v731_v47 = vpack.c.bf16 %v264_v44, %v262_v43  ;;  %v266_v49 = vld [vmem:[#allocation7 + $0x80] sm:$0xff]  ;;  %v268_v50 = vld [vmem:[#allocation7 + $0x90] sm:$0xff] }
  0x63   :  { %v733_v48 = vpack.c.bf16 %v269_v46, %v267_v45  ;;  %v271_v51 = vld [vmem:[#allocation7 + $0xa8] sm:$0xff]  ;;  %v273_v52 = vld [vmem:[#allocation7 + $0xb8] sm:$0xff]  ;;  %v735_v53 = vpack.c.bf16 %v268_v50, %v266_v49  ;;  %v270_v55 = vld [vmem:[#allocation7 + $0xa0] sm:$0xff]  ;;  %vm208_vm1 = vcmp.lt.s32.totalorder %v206_v29, 32 }
  0x64   :  { %v737_v54 = vpack.c.bf16 %v273_v52, %v271_v51  ;;  %v272_v56 = vld [vmem:[#allocation7 + $0xb0] sm:$0xff]  ;;  %v275_v57 = vld [vmem:[#allocation7 + $0xc8] sm:$0xff]  ;;  %v277_v58 = vld [vmem:[#allocation7 + $0xd8] sm:$0xff] }
  0x65   :  { %724 = vmatpush1.bf16.msra.mxu1 %v723_v35  ;;  %v739_v59 = vpack.c.bf16 %v272_v56, %v270_v55  ;;  %v741_v60 = vpack.c.bf16 %v277_v58, %v275_v57  ;;  %v274_v61 = vld [vmem:[#allocation7 + $0xc0] sm:$0xff]  ;;  %v276_v62 = vld [vmem:[#allocation7 + $0xd0] sm:$0xff]  ;;  %v279_v63 = vld [vmem:[#allocation7 + $0xe8] sm:$0xff] }
  0x66   :  { %726 = vmatprep.subr.bf16.mxu1 %v725_v36  ;;  %v281_v0 = vld [vmem:[#allocation7 + $0xf8] sm:$0xff]  ;;  %v743_v1 = vpack.c.bf16 %v276_v62, %v274_v61  ;;  %v278_v3 = vld [vmem:[#allocation7 + $0xe0] sm:$0xff]  ;;  %v280_v4 = vld [vmem:[#allocation7 + $0xf0] sm:$0xff] }
  0x67   :  { %v745_v2 = vpack.c.bf16 %v281_v0, %v279_v63  ;;  %v283_v5 = vld [vmem:[#allocation7 + $0x108] sm:$0xff]  ;;  %v285_v6 = vld [vmem:[#allocation7 + $0x118] sm:$0xff]  ;;  %v747_v7 = vpack.c.bf16 %v280_v4, %v278_v3  ;;  %v282_v11 = vld [vmem:[#allocation7 + $0x100] sm:$0xff] }
  0x68   :  { %v749_v9 = vpack.c.bf16 %v285_v6, %v283_v5  ;;  %v291_v22 = vld [vmem:[#allocation7 + $0x148] sm:$0xff]  ;;  %v293_v23 = vld [vmem:[#allocation7 + $0x158] sm:$0xff]  ;;  %v290_v26 = vld [vmem:[#allocation7 + $0x140] sm:$0xff] }
  0x69   :  { %728 = vmatpush1.bf16.msra.mxu1 %v727_v41  ;;  %v757_v25 = vpack.c.bf16 %v293_v23, %v291_v22  ;;  %v292_v27 = vld [vmem:[#allocation7 + $0x150] sm:$0xff]  ;;  %v295_v35 = vld [vmem:[#allocation7 + $0x168] sm:$0xff]  ;;  %v297_v36 = vld [vmem:[#allocation7 + $0x178] sm:$0xff] }
  0x6a   :  { %730 = vmatprep.subr.bf16.mxu1 %v729_v42  ;;  %v759_v28 = vpack.c.bf16 %v292_v27, %v290_v26  ;;  %v761_v37 = vpack.c.bf16 %v297_v36, %v295_v35  ;;  %v294_v38 = vld [vmem:[#allocation7 + $0x160] sm:$0xff]  ;;  %v296_v39 = vld [vmem:[#allocation7 + $0x170] sm:$0xff]  ;;  %v299_v8 = vld [vmem:[#allocation7 + $0x188] sm:$0xff] }
  0x6b   :  { %v763_v40 = vpack.c.bf16 %v296_v39, %v294_v38  ;;  %v301_v41 = vld [vmem:[#allocation7 + $0x198] sm:$0xff]  ;;  %v298_v43 = vld [vmem:[#allocation7 + $0x180] sm:$0xff]  ;;  %v307_v49 = vld [vmem:[#allocation7 + $0x1c8] sm:$0xff] }
  0x6c   :  { %v765_v42 = vpack.c.bf16 %v301_v41, %v299_v8  ;;  %v305_v45 = vld [vmem:[#allocation7 + $0x1b8] sm:$0xff]  ;;  %v302_v46 = vld [vmem:[#allocation7 + $0x1a0] sm:$0xff]  ;;  %v311_v55 = vld [vmem:[#allocation7 + $0x1e8] sm:$0xff] }
  0x6d   :  { %732 = vmatpush1.bf16.msra.mxu1 %v731_v47  ;;  %v304_v47 = vld [vmem:[#allocation7 + $0x1b0] sm:$0xff]  ;;  %v309_v50 = vld [vmem:[#allocation7 + $0x1d8] sm:$0xff]  ;;  %v400_v62 = vld [vmem:[#allocation8 + $0x8] sm:$0xff] }
  0x6e   :  { %734 = vmatprep.subr.bf16.mxu1 %v733_v48  ;;  %v771_v51 = vpack.c.bf16 %v304_v47, %v302_v46  ;;  %v773_v52 = vpack.c.bf16 %v309_v50, %v307_v49  ;;  %v313_v56 = vld [vmem:[#allocation7 + $0x1f8] sm:$0xff]  ;;  %v399_v0 = vld [vmem:[#allocation8] sm:$0xff]  ;;  %v404_v3 = vld [vmem:[#allocation8 + $0x28] sm:$0xff] }
  0x6f   :  { %v777_v58 = vpack.c.bf16 %v313_v56, %v311_v55  ;;  %v402_v63 = vld [vmem:[#allocation8 + $0x18] sm:$0xff]  ;;  %v416_v26 = vld [vmem:[#allocation8 + $0x88] sm:$0xff]  ;;  %v421_v38 = vld [vmem:[#allocation8 + $0xb0] sm:$0xff] }
  0x70   :  { %v406_v4 = vld [vmem:[#allocation8 + $0x38] sm:$0xff]  ;;  %v424_v39 = vld [vmem:[#allocation8 + $0xc8] sm:$0xff]  ;;  %v427_v46 = vld [vmem:[#allocation8 + $0xe0] sm:$0xff] }
  0x71   :  { %736 = vmatpush1.bf16.msra.mxu1 %v735_v53  ;;  %v306_v53 = vld [vmem:[#allocation7 + $0x1c0] sm:$0xff]  ;;  %v785_v6 = vpack.c.bf16 %v406_v4, %v404_v3  ;;  %v418_v27 = vld [vmem:[#allocation8 + $0x98] sm:$0xff]  ;;  %v429_v47 = vld [vmem:[#allocation8 + $0xf0] sm:$0xff] }
  0x72   :  { %738 = vmatprep.subr.bf16.mxu1 %v737_v54  ;;  %v308_v54 = vld [vmem:[#allocation7 + $0x1d0] sm:$0xff]  ;;  %v797_v29 = vpack.c.bf16 %v418_v27, %v416_v26  ;;  %v434_v49 = vld [vmem:[#allocation8 + $0x118] sm:$0xff]  ;;  %v811_v50 = vpack.c.bf16 %v429_v47, %v427_v46  ;;  %v460_v46 = vld [vmem:[#allocation8 + $0x1e8] sm:$0xff] }
  0x73   :  { %v775_v57 = vpack.c.bf16 %v308_v54, %v306_v53  ;;  %v433_v53 = vld [vmem:[#allocation8 + $0x110] sm:$0xff]  ;;  %v436_v54 = vld [vmem:[#allocation8 + $0x128] sm:$0xff]  ;;  %v438_v55 = vld [vmem:[#allocation8 + $0x138] sm:$0xff] }
  0x74   :  { %v446_v3 = vld [vmem:[#allocation8 + $0x178] sm:$0xff] }
  0x75   :  { %740 = vmatpush1.bf16.msra.mxu1 %v739_v59  ;;  %v310_v59 = vld [vmem:[#allocation7 + $0x1e0] sm:$0xff]  ;;  %v458_v26 = vld [vmem:[#allocation8 + $0x1d8] sm:$0xff] }
  0x76   :  { %742 = vmatprep.subr.bf16.mxu1 %v741_v60  ;;  %v312_v60 = vld [vmem:[#allocation7 + $0x1f0] sm:$0xff]  ;;  %v462_v47 = vld [vmem:[#allocation8 + $0x1f8] sm:$0xff] }
  0x77   :  { %v779_v61 = vpack.c.bf16 %v312_v60, %v310_v59  ;;  %v437_v59 = vld [vmem:[#allocation8 + $0x130] sm:$0xff]  ;;  %v440_v60 = vld [vmem:[#allocation8 + $0x148] sm:$0xff] }
  0x79   :  { %744 = vmatpush1.bf16.msra.mxu1 %v743_v1  ;;  %v781_v1 = vpack.c.bf16 %v402_v63, %v400_v62 }
  0x7a   :  { %746 = vmatprep.subr.bf16.mxu1 %v745_v2  ;;  %v401_v2 = vld [vmem:[#allocation8 + $0x10] sm:$0xff] }
  0x7b   :  { %v783_v5 = vpack.c.bf16 %v401_v2, %v399_v0  ;;  %782 = vmatprep.subr.bf16.mxu0 %v781_v1  ;;  %v439_v0 = vld [vmem:[#allocation8 + $0x140] sm:$0xff]  ;;  %v441_v1 = vld [vmem:[#allocation8 + $0x150] sm:$0xff]  ;;  %v444_v2 = vld [vmem:[#allocation8 + $0x168] sm:$0xff] }
  0x7c   :  { %v823_v4 = vpack.c.bf16 %v441_v1, %v439_v0 }
  0x7d   :  { %748 = vmatpush1.bf16.msra.mxu1 %v747_v7  ;;  %v403_v7 = vld [vmem:[#allocation8 + $0x20] sm:$0xff]  ;;  %784 = vmatpush1.bf16.msra.mxu0 %v783_v5  ;;  %v825_v5 = vpack.c.bf16 %v446_v3, %v444_v2  ;;  %v553_v3 = vld [vmem:[#allocation10 + $0x28] sm:$0xff] }
  0x7e   :  { %750 = vmatprep.subr.bf16.mxu1 %v749_v9  ;;  %v405_v9 = vld [vmem:[#allocation8 + $0x30] sm:$0xff]  ;;  %786 = vmatprep.subr.bf16.mxu0 %v785_v6  ;;  %v443_v6 = vld [vmem:[#allocation8 + $0x160] sm:$0xff] }
  0x7f   :  { %v552_v2 = vld [vmem:[#allocation10 + $0x20] sm:$0xff] }
 0x134   :  { %v192_v15 = vpop.f32.mrb[0].mxu0 }
 0x135   :  { %v1182_v16 = vadd.f32 %v192_v15, %v115_v13  ;;  %v194_v17 = vpop.f32.mrb[1].mxu0  ;;  %v284_v13 = vld [vmem:[#allocation7 + $0x110] sm:$0xff]  ;;  %v289_v15 = vld [vmem:[#allocation7 + $0x138] sm:$0xff] }
 0x136   :  { %v195_v18 = vadd.f32 %v194_v17, %v119_v14  ;;  %v287_v14 = vld [vmem:[#allocation7 + $0x128] sm:$0xff]  ;;  %v751_v17 = vpack.c.bf16 %v284_v13, %v282_v11  ;;  %v410_v13 = vld [vmem:[#allocation8 + $0x58] sm:$0xff] }
 0x137   :  { %v197_v19 = vmax.f32 %v1182_v16, 0.0  ;;  %v300_v16 = vld [vmem:[#allocation7 + $0x190] sm:$0xff]  ;;  %v408_v11 = vld [vmem:[#allocation8 + $0x48] sm:$0xff] }
 0x138   :  { %v198_v20 = vmax.f32 %v195_v18, 0.0  ;;  %v753_v18 = vpack.c.bf16 %v289_v15, %v287_v14  ;;  %752 = vmatpush1.bf16.msra.mxu1 %v751_v17  ;;  %v767_v44 = vpack.c.bf16 %v300_v16, %v298_v43  ;;  %v787_v14 = vpack.c.bf16 %v405_v9, %v403_v7  ;;  %v407_v17 = vld [vmem:[#allocation8 + $0x40] sm:$0xff]  ;;  %v425_v43 = vld [vmem:[#allocation8 + $0xd0] sm:$0xff]  ;;  %v428_v16 = vld [vmem:[#allocation8 + $0xe8] sm:$0xff] }
 0x139   :  { %v789_v15 = vpack.c.bf16 %v410_v13, %v408_v11  ;;  %v445_v7 = vld [vmem:[#allocation8 + $0x170] sm:$0xff]  ;;  %v448_v9 = vld [vmem:[#allocation8 + $0x188] sm:$0xff]  ;;  %v450_v11 = vld [vmem:[#allocation8 + $0x198] sm:$0xff] }
 0x13a   :  { %v199_v21 = vadd.f32 %v198_v20, %v197_v19  ;;  %v286_v20 = vld [vmem:[#allocation7 + $0x120] sm:$0xff]  ;;  %754 = vmatprep.subr.bf16.mxu1 %v753_v18  ;;  %v409_v18 = vld [vmem:[#allocation8 + $0x50] sm:$0xff]  ;;  %788 = vmatpush1.bf16.msra.mxu0 %v787_v14  ;;  %v827_v13 = vpack.c.bf16 %v445_v7, %v443_v6  ;;  %v829_v14 = vpack.c.bf16 %v450_v11, %v448_v9  ;;  %v555_v11 = vld [vmem:[#allocation10 + $0x38] sm:$0xff] }
 0x13b   :  { %v791_v22 = vpack.c.bf16 %v409_v18, %v407_v17  ;;  %790 = vmatprep.subr.bf16.mxu0 %v789_v15  ;;  %v447_v15 = vld [vmem:[#allocation8 + $0x180] sm:$0xff]  ;;  %v449_v17 = vld [vmem:[#allocation8 + $0x190] sm:$0xff]  ;;  %v452_v18 = vld [vmem:[#allocation8 + $0x1a8] sm:$0xff]  ;;  %v855_v6 = vpack.c.bf16 %v553_v3, %v552_v2 }
 0x13c   :  { %200 = vadd.xlane.f32.xlu0 %v199_v21  ;;  %v288_v21 = vld [vmem:[#allocation7 + $0x130] sm:$0xff] }
 0x13d   :  { %v755_v24 = vpack.c.bf16 %v288_v21, %v286_v20  ;;  %v412_v20 = vld [vmem:[#allocation8 + $0x68] sm:$0xff]  ;;  %v414_v21 = vld [vmem:[#allocation8 + $0x78] sm:$0xff]  ;;  %v554_v9 = vld [vmem:[#allocation10 + $0x30] sm:$0xff] }
 0x13e   :  { %v793_v23 = vpack.c.bf16 %v414_v21, %v412_v20  ;;  %792 = vmatpush1.bf16.msra.mxu0 %v791_v22  ;;  %v454_v20 = vld [vmem:[#allocation8 + $0x1b8] sm:$0xff]  ;;  %v831_v21 = vpack.c.bf16 %v449_v17, %v447_v15  ;;  %v859_v15 = vpack.c.bf16 %v555_v11, %v554_v9 }
 0x13f   :  { %756 = vmatpush1.bf16.msra.mxu1 %v755_v24  ;;  %v411_v24 = vld [vmem:[#allocation8 + $0x60] sm:$0xff]  ;;  %v833_v22 = vpack.c.bf16 %v454_v20, %v452_v18  ;;  %v557_v20 = vld [vmem:[#allocation10 + $0x48] sm:$0xff] }
 0x140   :  { %758 = vmatprep.subr.bf16.mxu1 %v757_v25  ;;  %v413_v25 = vld [vmem:[#allocation8 + $0x70] sm:$0xff]  ;;  %794 = vmatprep.subr.bf16.mxu0 %v793_v23  ;;  %v451_v23 = vld [vmem:[#allocation8 + $0x1a0] sm:$0xff] }
 0x141   :  { %v556_v18 = vld [vmem:[#allocation10 + $0x40] sm:$0xff] }
 0x143   :  { %760 = vmatpush1.bf16.msra.mxu1 %v759_v28  ;;  %v795_v28 = vpack.c.bf16 %v413_v25, %v411_v24  ;;  %v453_v24 = vld [vmem:[#allocation8 + $0x1b0] sm:$0xff]  ;;  %v456_v25 = vld [vmem:[#allocation8 + $0x1c8] sm:$0xff] }
 0x144   :  { %762 = vmatprep.subr.bf16.mxu1 %v761_v37  ;;  %v419_v37 = vld [vmem:[#allocation8 + $0xa0] sm:$0xff]  ;;  %v835_v27 = vpack.c.bf16 %v453_v24, %v451_v23  ;;  %v863_v23 = vpack.c.bf16 %v557_v20, %v556_v18 }
 0x145   :  { %796 = vmatpush1.bf16.msra.mxu0 %v795_v28  ;;  %v803_v8 = vpack.c.bf16 %v421_v38, %v419_v37  ;;  %v837_v28 = vpack.c.bf16 %v458_v26, %v456_v25  ;;  %v558_v25 = vld [vmem:[#allocation10 + $0x50] sm:$0xff]  ;;  %v559_v26 = vld [vmem:[#allocation10 + $0x58] sm:$0xff] }
 0x146   :  { %798 = vmatprep.subr.bf16.mxu0 %v797_v29 }
 0x147   :  { %764 = vmatpush1.bf16.msra.mxu1 %v763_v40  ;;  %v426_v40 = vld [vmem:[#allocation8 + $0xd8] sm:$0xff] }
 0x148   :  { %766 = vmatprep.subr.bf16.mxu1 %v765_v42  ;;  %v805_v41 = vpack.c.bf16 %v426_v40, %v424_v39  ;;  %v423_v42 = vld [vmem:[#allocation8 + $0xc0] sm:$0xff] }
 0x14b   :  { %768 = vmatpush1.bf16.msra.mxu1 %v767_v44  ;;  %v807_v44 = vpack.c.bf16 %v425_v43, %v423_v42 }
 0x1c9   :  { %v201_v30 = vpop.xlane.xlu0 %200 }
 0x1ca   :  { %v202_v31 = vmul.f32 0.03125, %v201_v30  ;;  %v415_v30 = vld [vmem:[#allocation8 + $0x80] sm:$0xff] }
 0x1cc   :  { %v203_v32 = vsub.f32 %v197_v19, %v202_v31  ;;  %v303_v19 = vld [vmem:[#allocation7 + $0x1a8] sm:$0xff]  ;;  %v417_v31 = vld [vmem:[#allocation8 + $0x90] sm:$0xff] }
 0x1cd   :  { %v769_v48 = vpack.c.bf16 %v305_v45, %v303_v19  ;;  %v799_v35 = vpack.c.bf16 %v417_v31, %v415_v30  ;;  %v430_v19 = vld [vmem:[#allocation8 + $0xf8] sm:$0xff] }
 0x1ce   :  { %v1190_v33 = vsel %vm208_vm1, %v203_v32, 0.0  ;;  %v420_v32 = vld [vmem:[#allocation8 + $0xa8] sm:$0xff]  ;;  %v809_v45 = vpack.c.bf16 %v430_v19, %v428_v16  ;;  %v455_v19 = vld [vmem:[#allocation8 + $0x1c0] sm:$0xff] }
 0x1cf   :  { %v212_v34 = vmul.f32 %v1190_v33, %v1190_v33  ;;  %770 = vmatprep.subr.bf16.mxu1 %v769_v48  ;;  %800 = vmatpush1.bf16.msra.mxu0 %v799_v35  ;;  %v432_v48 = vld [vmem:[#allocation8 + $0x108] sm:$0xff] }
 0x1d0   :  { %772 = vmatpush1.bf16.msra.mxu1 %v771_v51  ;;  %v813_v51 = vpack.c.bf16 %v434_v49, %v432_v48  ;;  %v841_v48 = vpack.c.bf16 %v462_v47, %v460_v46  ;;  %v459_v49 = vld [vmem:[#allocation8 + $0x1e0] sm:$0xff]  ;;  %v463_v47 = vld [vmem:[%s1238_s8] sm:$0x3]  ;;  %s1042_s8 = smov [#allocation11]  }
 0x1d1   :  { %215 = vadd.xlane.f32.xlu0 %v212_v34  ;;  %774 = vmatprep.subr.bf16.mxu1 %v773_v52  ;;  %v422_v34 = vld [vmem:[#allocation8 + $0xb8] sm:$0xff]  ;;  %v431_v52 = vld [vmem:[#allocation8 + $0x100] sm:$0xff]  ;;  %s665_s29 = sshll.u32 %s1042_s8, 4  ;;  %s666_s29 = int_to_ptr.vmem [resolvable:$true] %s665_s29 }
 0x1d2   :  { %v801_v36 = vpack.c.bf16 %v422_v34, %v420_v32  ;;  %v815_v56 = vpack.c.bf16 %v433_v53, %v431_v52  ;;  %v222_v32 = vld [vmem:[%s1233_s3] sm:$0x3]  ;;  %v564_v52 = vld [vmem:[#allocation10 + $0x80] sm:$0xff]  ;;  %s1002_s0 = scalar_lea.vmem %s666_s29, 128  ;;  %p1007_p13 = scmp.lt.s32.totalorder %s666_s29, %s666_s29 }
 0x1d3   :  { %v236_v34 = vld [vmem:[%s1234_s4] sm:$0x3]  ;;  %v227_v35 = vrot.slane %v222_v32, %v1173_v10  ;;  %v548_v53 = vld [vmem:[#allocation10] sm:$0xff]  ;;  %p1003_p12 = scmp.ne.s32.totalorder %s666_s29, %s1002_s0  ;;  %p1008_p0 = scmp.lt.s32.totalorder %s1002_s0, %s1002_s0 }
 0x1d4   :  { %776 = vmatpush1.bf16.msra.mxu1 %v775_v57  ;;  %802 = vmatprep.subr.bf16.mxu0 %v801_v36  ;;  %v817_v57 = vpack.c.bf16 %v438_v55, %v436_v54  ;;  %v231_v36 = vrot.slane %v222_v32, %v1178_v12  ;;  %v241_v39 = vrot.slane %v236_v34, %v1173_v10  ;;  %v549_v55 = vld [vmem:[#allocation10 + $0x8] sm:$0xff] }
 0x1d5   :  { %778 = vmatprep.subr.bf16.mxu1 %v777_v58  ;;  %804 = vmatpush1.bf16.msra.mxu0 %v803_v8  ;;  %v435_v58 = vld [vmem:[#allocation8 + $0x120] sm:$0xff]  ;;  %v245_v40 = vrot.slane %v236_v34, %v1178_v12  ;;  %p1009_p1 = por %p1008_p0, %p1007_p13 }
 0x1d6   :  { %806 = vmatprep.subr.bf16.mxu0 %v805_v41  ;;  %v819_v62 = vpack.c.bf16 %v437_v59, %v435_v58  ;;  %v847_v58 = vpack.c.bf16 %v549_v55, %v548_v53 }
 0x1d7   :  { %p1010_p2 = pnand %p1009_p1, %p1003_p12 }
 0x1d8   :  { %780 = vmatpush1.bf16.msra.mxu1 %v779_v61  ;;  %v442_v61 = vld [vmem:[#allocation8 + $0x158] sm:$0xff] }
 0x1d9   :  { %808 = vmatpush1.bf16.msra.mxu0 %v807_v44  ;;  %v821_v63 = vpack.c.bf16 %v442_v61, %v440_v60  ;;  %v457_v44 = vld [vmem:[#allocation8 + $0x1d0] sm:$0xff]  ;;  %v551_v61 = vld [vmem:[#allocation10 + $0x18] sm:$0xff] }
 0x1da   :  { %810 = vmatprep.subr.bf16.mxu0 %v809_v45  ;;  %v839_v45 = vpack.c.bf16 %v457_v44, %v455_v19  ;;  %v550_v60 = vld [vmem:[#allocation10 + $0x10] sm:$0xff] }
 0x1db   :  { %v851_v0 = vpack.c.bf16 %v551_v61, %v550_v60  ;;  %v562_v44 = vld [vmem:[#allocation10 + $0x70] sm:$0xff] }
 0x1dd   :  { %812 = vmatpush1.bf16.msra.mxu0 %v811_v50  ;;  %v461_v50 = vld [vmem:[#allocation8 + $0x1f0] sm:$0xff] }
 0x1de   :  { %814 = vmatprep.subr.bf16.mxu0 %v813_v51  ;;  %v843_v51 = vpack.c.bf16 %v461_v50, %v459_v49  ;;  %v472_v49 = vrot.slane %v463_v47, %v1178_v12 }
 0x1e1   :  { %816 = vmatpush1.bf16.msra.mxu0 %v815_v56  ;;  %v566_v56 = vld [vmem:[#allocation10 + $0x90] sm:$0xff] }
 0x1e2   :  { %818 = vmatprep.subr.bf16.mxu0 %v817_v57  ;;  %v567_v57 = vld [vmem:[#allocation10 + $0x98] sm:$0xff] }
 0x1e3   :  { %v849_v59 = vpack.c.bf16 %v567_v57, %v566_v56  ;;  %v677_v56 = vld [vmem:[%s1240_s10] ss:$0 sm:$0xff] }
 0x1e5   :  { %820 = vmatpush1.bf16.msra.mxu0 %v819_v62  ;;  %v568_v62 = vld [vmem:[#allocation10 + $0xa0] sm:$0xff] }
 0x1e6   :  { %822 = vmatprep.subr.bf16.mxu0 %v821_v63  ;;  %v569_v63 = vld [vmem:[#allocation10 + $0xa8] sm:$0xff] }
 0x1e7   :  { %v853_v1 = vpack.c.bf16 %v569_v63, %v568_v62 }
 0x1e9   :  { %824 = vmatpush1.bf16.msra.mxu0 %v823_v4  ;;  %v570_v4 = vld [vmem:[#allocation10 + $0xb0] sm:$0xff] }
 0x1ea   :  { %826 = vmatprep.subr.bf16.mxu0 %v825_v5  ;;  %v571_v5 = vld [vmem:[#allocation10 + $0xb8] sm:$0xff] }
 0x1eb   :  { %v857_v7 = vpack.c.bf16 %v571_v5, %v570_v4 }
 0x1ed   :  { %828 = vmatpush1.bf16.msra.mxu0 %v827_v13  ;;  %v572_v13 = vld [vmem:[#allocation10 + $0xc0] sm:$0xff] }
 0x1ee   :  { %830 = vmatprep.subr.bf16.mxu0 %v829_v14  ;;  %v573_v14 = vld [vmem:[#allocation10 + $0xc8] sm:$0xff] }
 0x1ef   :  { %v861_v17 = vpack.c.bf16 %v573_v14, %v572_v13 }
 0x1f1   :  { %832 = vmatpush1.bf16.msra.mxu0 %v831_v21  ;;  %v574_v21 = vld [vmem:[#allocation10 + $0xd0] sm:$0xff] }
 0x1f2   :  { %834 = vmatprep.subr.bf16.mxu0 %v833_v22  ;;  %v575_v22 = vld [vmem:[#allocation10 + $0xd8] sm:$0xff] }
 0x1f3   :  { %v865_v24 = vpack.c.bf16 %v575_v22, %v574_v21 }
 0x1f5   :  { %836 = vmatpush1.bf16.msra.mxu0 %v835_v27  ;;  %v576_v27 = vld [vmem:[#allocation10 + $0xe0] sm:$0xff] }
 0x1f6   :  { %838 = vmatprep.subr.bf16.mxu0 %v837_v28  ;;  %v577_v28 = vld [vmem:[#allocation10 + $0xe8] sm:$0xff] }
 0x1f9   :  { %840 = vmatpush1.bf16.msra.mxu0 %v839_v45  ;;  %v563_v45 = vld [vmem:[#allocation10 + $0x78] sm:$0xff] }
 0x1fa   :  { %842 = vmatprep.subr.bf16.mxu0 %v841_v48  ;;  %v875_v46 = vpack.c.bf16 %v563_v45, %v562_v44  ;;  %v468_v48 = vrot.slane %v463_v47, %v1173_v10 }
 0x1fd   :  { %844 = vmatpush1.bf16.msra.mxu0 %v843_v51 }
 0x25e   :  { %v216_v29 = vpop.xlane.xlu0 %215 }
 0x25f   :  { %v217_v30 = vmul.f32 0.03125, %v216_v29  ;;  %v867_v29 = vpack.c.bf16 %v559_v26, %v558_v25 }
 0x261   :  { %v218_v31 = vadd.f32 1e-05, %v217_v30  ;;  %v869_v30 = vpack.c.bf16 %v577_v28, %v576_v27 }
 0x263   :  { %888 = vrsqrt.f32 %v218_v31  ;;  %v314_v31 = vld [vmem:[%s1236_s6] sm:$0x3] }
 0x264   :  { %v319_v32 = vrot.slane %v314_v31, %v1173_v10  ;;  %v323_v34 = vrot.slane %v314_v31, %v1178_v12 }
 0x26d   :  { %v889_v37 = vpop.eup %888 }
 0x26e   :  { %v221_v38 = vmul.f32 0.0, %v889_v37  ;;  %v220_v8 = vmul.f32 %v889_v37, %v1190_v33  ;;  %v565_v33 = vld [vmem:[#allocation10 + $0x88] sm:$0xff] }
 0x26f   :  { %v845_v54 = vpack.c.bf16 %v565_v33, %v564_v52 }
 0x270   :  { %v235_v41 = vmul.f32 %v231_v36, %v221_v38  ;;  %v234_v42 = vmul.f32 %v227_v35, %v220_v8  ;;  %v560_v8 = vld [vmem:[#allocation10 + $0x60] sm:$0xff] }
 0x271   :  { %846 = vmatprep.subr.bf16.mxu1 %v845_v54 }
 0x272   :  { %v249_v43 = vadd.f32 %v245_v40, %v235_v41  ;;  %v248_v16 = vadd.f32 %v241_v39, %v234_v42  ;;  %v561_v41 = vld [vmem:[#allocation10 + $0x68] sm:$0xff] }
 0x273   :  { %v871_v42 = vpack.c.bf16 %v561_v41, %v560_v8 }
 0x274   :  { %390 = vmatprep.mubr.f32.mxu1 %v249_v43  ;;  %v578_v43 = vld [vmem:[#allocation10 + $0xf0] sm:$0xff] }
 0x275   :  { %391 = vmatmul.mubr.f32.vlgmr.msra.gmra.mrb[0].mxu1 %v248_v16  ;;  %v579_v16 = vld [vmem:[#allocation10 + $0xf8] sm:$0xff] }
 0x276   :  { %848 = vmatpush3.bf16.msra.mxu1 %v847_v58  ;;  %v873_v19 = vpack.c.bf16 %v579_v16, %v578_v43 }
 0x277   :  { %850 = vmatprep.subr.bf16.mxu1 %v849_v59 }
 0x27a   :  { %852 = vmatpush3.bf16.msra.mxu1 %v851_v0 }
 0x27b   :  { %854 = vmatprep.subr.bf16.mxu1 %v853_v1 }
 0x27e   :  { %856 = vmatpush3.bf16.msra.mxu1 %v855_v6 }
 0x27f   :  { %858 = vmatprep.subr.bf16.mxu1 %v857_v7 }
 0x282   :  { %860 = vmatpush3.bf16.msra.mxu1 %v859_v15 }
 0x283   :  { %862 = vmatprep.subr.bf16.mxu1 %v861_v17 }
 0x286   :  { %864 = vmatpush3.bf16.msra.mxu1 %v863_v23 }
 0x287   :  { %866 = vmatprep.subr.bf16.mxu1 %v865_v24 }
 0x28a   :  { %868 = vmatpush3.bf16.msra.mxu1 %v867_v29 }
 0x28b   :  { %870 = vmatprep.subr.bf16.mxu1 %v869_v30 }
 0x28e   :  { %872 = vmatpush3.bf16.msra.mxu1 %v871_v42 }
 0x28f   :  { %874 = vmatprep.subr.bf16.mxu1 %v873_v19 }
 0x292   :  { %876 = vmatpush3.bf16.msra.mxu1 %v875_v46 }
 0x348   :  { %v392_v35 = vpop.f32.mrb[0].mxu1 }
 0x349   :  { %v393_v36 = vadd.f32 %v392_v35, %v319_v32  ;;  %v394_v37 = vpop.f32.mrb[1].mxu1 }
 0x34a   :  { %v395_v38 = vadd.f32 %v394_v37, %v323_v34 }
 0x34b   :  { %v397_v40 = vmax.f32 %v393_v36, 0.0 }
 0x34c   :  { %v398_v39 = vmax.f32 %v395_v38, 0.0 }
 0x34e   :  { %539 = vmatprep.mubr.f32.mxu0 %v398_v39 }
 0x34f   :  { %540 = vmatmul.mubr.f32.vlgmr.msra.gmra.mrb[2].mxu0 %v397_v40 }
 0x422   :  { %v541_v50 = vpop.f32.mrb[2].mxu0 }
 0x423   :  { %v542_v51 = vadd.f32 %v541_v50, %v468_v48  ;;  %v543_v52 = vpop.f32.mrb[3].mxu0 }
 0x424   :  { %v544_v33 = vadd.f32 %v543_v52, %v472_v49 }
 0x425   :  { %v546_v54 = vmax.f32 %v542_v51, 0.0 }
 0x426   :  { %v547_v53 = vmax.f32 %v544_v33, 0.0 }
 0x428   :  { %651 = vmatprep.mubr.f32.mxu1 %v547_v53 }
 0x429   :  { %652 = vmatmul.mubr.f32.vlgmr.msra.gmra.mrb[2].mxu1 %v546_v54 }
 0x4fc   :  { %v710_v55 = vpop.f32.mrb[2].mxu1 }
 0x4fd   :  { %v711_v57 = vpop.f32.mrb[3].mxu1 }
 0x4fe   :  { %v712_v58 = vadd.f32 %v711_v57, %v710_v55 }
 0x500   :  { %v654_v59 = vadd.f32 %v712_v58, %v677_v56 }
 0x502   :  { %890 = vtanh.f32 %v654_v59 }
 0x50c   :  { %v891_v10 = vpop.eup %890 }
 0x50d   :  { %658 = vst [vmem:[#allocation11] sm:$0xff] %v891_v10 }
 0x50e   :  { %1013 = shalt.err (!%p1010_p2)
}
 0x50f   :  { %s1014_s10 = scalar_lea.hbm %s1241_s11, 128 }
 0x510   :  { %p1015_p3 = scmp.ne.s32.totalorder %s1241_s11, %s1014_s10  ;;  %p1018_p4 = scmp.lt.u32.totalorder %s1014_s10, %s1241_s11 }
 0x512   :  { %p1020_p5 = pnand %p1018_p4, %p1015_p3 }
 0x514   :  { %1023 = shalt.err (!%p1020_p5)
}
 0x515   :  { %668 = dma.vmem_to_hbm [thread:$0]  %s666_s29, 128, %s1241_s11, [#allocation4]  }
 0x516   :  { %1030 = dma.done.wait [#allocation4], 128  }
 0x517   :  { %1031 = vsyncadd [#allocation4], 4294967168 }
 0x518   :  { %672 = vsyncpa [#allocation3], 1 }
 0x519   :  { %673 = vsyncpa [#allocation6], 1 }
 0x51a   :  { %674 = vsyncpa [#allocation9], 1 }
 0x51b   :  { %675 = vsyncpa [#allocation4], 1 }

</bundles_post_ra>
